<compile_context>
chip_gen: v7x
topology: tpu7x:2x2x1
jax: 0.10.0
libtpu: 0.0.40
codegen_flags: <defaults>
</compile_context>

<pallas_src>
import functools

import jax
import jax.numpy as jnp
from jax.experimental import pallas as pl
from jax.experimental.pallas import tpu as pltpu

_LANE = 128
_SUBLANE = 8
_TILE_ROWS = 8192                        # (8192, 128) f32 = 4 MiB per grid step
_FUSED_LIMIT_BYTES = 4 * 1024 * 1024     # fused single-pass kernel at/below this
_VMEM_LIMIT_BYTES = 32 * 1024 * 1024     # explicit cap (v5e default scoped is 16 MiB)


# ----------------------------- Pallas kernels ------------------------------ #

def _fused_kernel(x_ref, o_ref, scale_ref, zp_ref, *, qmin, qmax, qparams_fn):
    """Single-pass fake dynamic quant: min/max -> qparams -> fake-quantize.

    The whole tensor is resident in VMEM, so x is read from HBM exactly once.
    """
    x = x_ref[...]
    min_val = jnp.min(x, keepdims=True)          # (1, 1)
    max_val = jnp.max(x, keepdims=True)          # (1, 1)
    scale, zp = qparams_fn(min_val, max_val)     # (1, 1) each, already clamped
    inv_scale = 1.0 / scale
    # Matches ATen fake_quantize_per_tensor_affine: nearbyint(x * inv_scale + zp)
    # (round-half-to-even, zero_point added before rounding).
    q = jnp.round(x * inv_scale + zp)
    q = jnp.clip(q, float(qmin), float(qmax))
    o_ref[...] = (q - zp) * scale
    scale_ref[...] = scale
    zp_ref[...] = zp


def _minmax_kernel(x_ref, min_ref, max_ref, min_acc, max_acc):
    """Per-tensor min/max over 4 MiB tiles with a single-vreg accumulator.

    Each tile is viewed as (tile_rows/8, 8, 128) (a layout-preserving reshape)
    and reduced over the leading axis - pure VALU work, one (8, 128) store per
    tile - so the vector-store slot no longer limits throughput and the
    reduction stays hidden under the tile DMA.  The cross-lane/sublane reduce
    to (1, 1) runs once, on the last step of the inner (reduction) axis; one
    partial result per leading ("parallel") grid index lets v7x megacore-shard
    the pass.  Partials are combined with a tiny jnp.min/max outside.
    """
    i = pl.program_id(1)

    @pl.when(i == 0)
    def _():
        min_acc[...] = jnp.full_like(min_acc, jnp.inf)
        max_acc[...] = jnp.full_like(max_acc, -jnp.inf)

    rows = x_ref.shape[0]
    x = x_ref[...].reshape(rows // _SUBLANE, _SUBLANE, _LANE)
    min_acc[...] = jnp.minimum(min_acc[...], jnp.min(x, axis=0))
    max_acc[...] = jnp.maximum(max_acc[...], jnp.max(x, axis=0))

    @pl.when(i == pl.num_programs(1) - 1)
    def _():
        min_ref[...] = jnp.min(min_acc[...], keepdims=True).reshape(1, 1, 1)
        max_ref[...] = jnp.max(max_acc[...], keepdims=True).reshape(1, 1, 1)


def _fake_quant_kernel(qp_ref, x_ref, o_ref, *, qmin, qmax):
    """fake_quantize_per_tensor_affine; qp_ref = [inv_scale, zero_point, scale] in SMEM."""
    inv_scale = qp_ref[0]
    zp = qp_ref[1]
    scale = qp_ref[2]
    q = jnp.round(x_ref[...] * inv_scale + zp)   # matches ATen (see _fused_kernel)
    q = jnp.clip(q, float(qmin), float(qmax))
    o_ref[...] = (q - zp) * scale


# ------------------------------ Pallas wrappers ----------------------------- #

def _flatten_to_2d(x):
    """Flatten to (rows, 128) with rows % 8 == 0.

    No copy when x.size is a multiple of 1024 (the common case for NN
    activations).  Ragged sizes pad with 'edge' values, which are
    min/max-neutral; the padded outputs are sliced off afterwards.
    """
    flat = x.reshape(-1)
    n = flat.shape[0]
    block = _LANE * _SUBLANE
    n_pad = ((n + block - 1) // block) * block
    if n_pad != n:
        # TODO(synk): jnp.pad copies the whole tensor; only non-multiple-of-1024
        # sizes pay this (at most 1023 dead elements, vs a full tile before).
        flat = jnp.pad(flat, (0, n_pad - n), mode="edge")
    return flat.reshape(n_pad // _LANE, _LANE), n_pad


def _pallas_fused(x2d, kernel):
    rows = x2d.shape[0]
    out, scale, zp = pl.pallas_call(
        kernel,
        out_shape=(jax.ShapeDtypeStruct((rows, _LANE), jnp.float32),
                   jax.ShapeDtypeStruct((1, 1), jnp.float32),
                   jax.ShapeDtypeStruct((1, 1), jnp.float32)),
        grid_spec=pltpu.PrefetchScalarGridSpec(
            num_scalar_prefetch=0,
            grid=(1,),
            in_specs=[pl.BlockSpec((rows, _LANE), lambda i: (0, 0))],
            out_specs=(pl.BlockSpec((rows, _LANE), lambda i: (0, 0)),
                       pl.BlockSpec((1, 1), lambda i: (0, 0)),
                       pl.BlockSpec((1, 1), lambda i: (0, 0)))),
        compiler_params=pltpu.CompilerParams(
            dimension_semantics=("arbitrary",),
            vmem_limit_bytes=_VMEM_LIMIT_BYTES),
    )(x2d)
    return out, scale[0, 0], zp[0, 0]


def _pallas_minmax(x2d, n_full_tiles):
    """Min/max over the first n_full_tiles * _TILE_ROWS rows of x2d."""
    inner = pl.cdiv(n_full_tiles, 2)

    def idx(pi, i):
        t = pi * inner + i
        # Always keep a real 2-wide "parallel" axis (both v7x TensorCores issue
        # DMAs).  For odd tile counts the single overhang iteration is clamped
        # onto the last valid tile: re-reducing an already-seen tile is a no-op
        # for min/max, so correctness is unaffected on any chip.
        return (jnp.minimum(t, n_full_tiles - 1), 0)

    n_elems = n_full_tiles * _TILE_ROWS * _LANE
    mn, mx = pl.pallas_call(
        _minmax_kernel,
        out_shape=(jax.ShapeDtypeStruct((2, 1, 1), jnp.float32),
                   jax.ShapeDtypeStruct((2, 1, 1), jnp.float32)),
        grid_spec=pltpu.PrefetchScalarGridSpec(
            num_scalar_prefetch=0,
            grid=(2, inner),
            in_specs=[pl.BlockSpec((_TILE_ROWS, _LANE), idx)],
            out_specs=(pl.BlockSpec((1, 1, 1), lambda pi, i: (pi, 0, 0)),
                       pl.BlockSpec((1, 1, 1), lambda pi, i: (pi, 0, 0))),
            scratch_shapes=[pltpu.VMEM((_SUBLANE, _LANE), jnp.float32),
                            pltpu.VMEM((_SUBLANE, _LANE), jnp.float32)]),
        compiler_params=pltpu.CompilerParams(
            dimension_semantics=("parallel", "arbitrary"),
            vmem_limit_bytes=_VMEM_LIMIT_BYTES),
        cost_estimate=pl.CostEstimate(
            flops=2 * n_elems, transcendentals=0, bytes_accessed=4 * n_elems),
    )(x2d)
    return jnp.min(mn), jnp.max(mx)


def _pallas_fake_quant(x2d, qp, qmin, qmax):
    rows = x2d.shape[0]
    n_blocks = pl.cdiv(rows, _TILE_ROWS)   # last block may be ragged: OOB reads
    #                                        are garbage but their outputs are
    #                                        discarded by Pallas boundary handling.
    kernel = functools.partial(_fake_quant_kernel, qmin=qmin, qmax=qmax)
    n_elems = rows * _LANE
    return pl.pallas_call(
        kernel,
        out_shape=jax.ShapeDtypeStruct((rows, _LANE), jnp.float32),
        grid_spec=pltpu.PrefetchScalarGridSpec(
            num_scalar_prefetch=0,
            grid=(n_blocks,),
            in_specs=[pl.BlockSpec(memory_space=pltpu.MemorySpace.SMEM),
                      pl.BlockSpec((_TILE_ROWS, _LANE), lambda i: (i, 0))],
            out_specs=pl.BlockSpec((_TILE_ROWS, _LANE), lambda i: (i, 0))),
        compiler_params=pltpu.CompilerParams(
            dimension_semantics=("parallel",),
            vmem_limit_bytes=_VMEM_LIMIT_BYTES),
        cost_estimate=pl.CostEstimate(
            flops=6 * n_elems, transcendentals=0, bytes_accessed=8 * n_elems),
    )(qp, x2d)


# ------------------------------- Module port -------------------------------- #

class FakeDynamicQuant:
    """JAX/Pallas port of the PyTorch FakeDynamicQuant module (no parameters)."""

    def __init__(self, reduce_range=True, dtype="quint8", bits=8, onnx_compatible=False):
        assert dtype in ("quint8", "qint8")
        self.bits = bits
        self.reduce_range = reduce_range if bits == 8 else False
        self.dtype = dtype
        self.onnx_compatible = onnx_compatible
        if dtype == "quint8":
            if self.reduce_range:
                self.qmin, self.qmax = 0, 2 ** (bits - 1)
            else:
                self.qmin, self.qmax = 0, 2 ** bits - 1
        elif self.reduce_range:
            self.qmin, self.qmax = -2 ** (bits - 2), 2 ** (bits - 2) - 1
        else:
            self.qmin, self.qmax = -2 ** (bits - 1), 2 ** (bits - 1) - 1

    def _calc_qparams(self, min_val, max_val):
        """scale / zero_point from per-tensor min/max.

        Works on rank-0 values (plain-JAX glue on the tiled path) and on (1,1)
        values (inside the fused Pallas kernel).  Mirrors torch
        MinMaxObserver._calculate_qparams for bits==8 and the module's custom
        path otherwise.
        """
        if self.bits == 8:
            # TODO(synk): OnnxDynamicObserver (onnx_compatible=True) qparams path
            # is not implemented; MinMaxObserver semantics are used.
            if self.dtype == "quint8":
                oq_min, oq_max = 0, 255
            else:
                oq_min, oq_max = -128, 127
            if self.reduce_range:
                oq_min, oq_max = oq_min // 2, oq_max // 2
            eps = jnp.float32(jnp.finfo(jnp.float32).eps)
            min_neg = jnp.minimum(min_val, 0.0)
            max_pos = jnp.maximum(max_val, 0.0)
            if self.dtype == "quint8":       # per_tensor_affine
                scale = (max_pos - min_neg) / float(oq_max - oq_min)
                scale = jnp.maximum(scale, eps)
                zp = float(oq_min) - jnp.round(min_neg / scale)
                zp = jnp.clip(zp, float(oq_min), float(oq_max))
            else:                            # qint8 -> per_tensor_symmetric
                max_pos = jnp.maximum(-min_neg, max_pos)
                scale = max_pos / (float(oq_max - oq_min) / 2.0)
                scale = jnp.maximum(scale, eps)
                zp = jnp.zeros_like(scale)
        else:
            # >8-bit path copied from the reference module.  The reference does
            # not clamp initial_scale; the eps clamp below only guards the
            # degenerate constant-tensor case (max == min) against inf/NaN.
            eps = jnp.float32(jnp.finfo(jnp.float32).eps)
            initial_scale = (max_val - min_val) / float(self.qmax - self.qmin)
            initial_scale = jnp.maximum(initial_scale, eps)
            min_zp = self.qmin - min_val / initial_scale
            max_zp = self.qmax - max_val / initial_scale
            min_zp_err = abs(self.qmin) - jnp.abs(min_val / initial_scale)
            max_zp_err = abs(self.qmax) - jnp.abs(max_val / initial_scale)
            zp = jnp.round(jnp.where(min_zp_err < max_zp_err, min_zp, max_zp))
            scale = initial_scale
        # Module-level clamp of zero_point to the module's own [qmin, qmax].
        # NOTE: for quint8 + reduce_range the module uses qmax=128 while the
        # observer uses 127 -- this quirk of the reference is reproduced on
        # purpose (the fake-quantize clip also uses 128).
        zp = jnp.clip(zp, float(self.qmin), float(self.qmax))
        return scale, zp

    def __call__(self, x):
        if x.dtype != jnp.float32:
            return x
        n = int(x.size)
        if n == 0:
            return x

        block = _SUBLANE * _LANE
        n_padded = ((n + block - 1) // block) * block

        if n_padded * 4 <= _FUSED_LIMIT_BYTES:
            # Single fused pass: one HBM read + one HBM write of x, no glue ops.
            x2d, n_pad = _flatten_to_2d(x)
            kernel = functools.partial(
                _fused_kernel, qmin=self.qmin, qmax=self.qmax,
                qparams_fn=self._calc_qparams)
            out2d, scale, zp = _pallas_fused(x2d, kernel)
        else:
            # Two-pass tiled pipeline over 4 MiB (8192, 128) blocks.
            x2d, n_pad = _flatten_to_2d(x)
            rows = x2d.shape[0]
            n_full = rows // _TILE_ROWS
            assert n_full >= 1  # guaranteed: padded bytes > _FUSED_LIMIT_BYTES
            min_val, max_val = _pallas_minmax(x2d, n_full)
            tail_rows = rows - n_full * _TILE_ROWS
            if tail_rows:
                # Short ragged tail (< one tile, multiple of 8 rows): fold it in
                # with a tiny XLA reduce instead of padding x up to a full tile.
                tail = x2d[n_full * _TILE_ROWS:]
                min_val = jnp.minimum(min_val, jnp.min(tail))
                max_val = jnp.maximum(max_val, jnp.max(tail))
            scale, zp = self._calc_qparams(min_val, max_val)
            qp = jnp.stack([1.0 / scale, zp, scale]).astype(jnp.float32)
            out2d = _pallas_fake_quant(x2d, qp, self.qmin, self.qmax)

        # NOTE: under jax.jit these are tracers (kept only for module fidelity;
        # they do not persist as concrete module state like the torch version).
        self._scale, self._zero_pointer = scale, zp

        out = out2d.reshape(-1)
        if n_pad != n:
            out = out[:n]
        return out.reshape(x.shape)


# -------------------------- plain-JAX references ---------------------------- #

def _ref_quint8_reduce_range(x):
    eps = jnp.finfo(jnp.float32).eps
    mn = jnp.minimum(jnp.min(x), 0.0)
    mx = jnp.maximum(jnp.max(x), 0.0)
    scale = jnp.maximum((mx - mn) / 127.0, eps)
    zp = jnp.clip(0.0 - jnp.round(mn / scale), 0.0, 127.0)
    q = jnp.clip(jnp.round(x * (1.0 / scale) + zp), 0.0, 128.0)   # module qmax quirk
    return (q - zp) * scale, scale


def _ref_qint8_reduce_range(x):
    eps = jnp.finfo(jnp.float32).eps
    mn = jnp.minimum(jnp.min(x), 0.0)
    mx = jnp.maximum(jnp.max(x), 0.0)
    scale = jnp.maximum(jnp.maximum(-mn, mx) / 63.5, eps)
    q = jnp.clip(jnp.round(x * (1.0 / scale)), -64.0, 63.0)
    return q * scale, scale


def _check(y, ref, scale, name):
    assert y.shape == ref.shape and y.dtype == ref.dtype, name
    diff = jnp.abs(y - ref)
    max_diff = float(jnp.max(diff))
    step = float(scale)
    # Expect (near-)exact match; allow a quantization step of slack on values
    # whose scaled input lands within 1 ulp of a .5 rounding boundary.
    n_off = int(jnp.sum(diff > 1e-5))
    assert max_diff <= step * 1.001 + 1e-6, (name, max_diff, step)
    assert n_off <= max(1, y.size // 1000), (name, n_off, int(y.size))


# ----------------------------------- main ----------------------------------- #

if __name__ == "__main__":
    key = jax.random.PRNGKey(0)
    k1, k2, k3, k4 = jax.random.split(key, 4)

    # 1) small NCHW activation -> fused single-pass kernel path (quint8, affine)
    x_small = jax.random.normal(k1, (2, 4, 16, 16), dtype=jnp.float32)
    quant = FakeDynamicQuant()                    # quint8, reduce_range=True, bits=8
    y_small = jax.block_until_ready(quant(x_small))
    ref_small, s_small = _ref_quint8_reduce_range(x_small)
    _check(y_small, ref_small, s_small, "fused/quint8")

    # 2) >4 MiB activation -> two-pass tiled path (4 MiB tiles, odd full-tile
    #    count exercises the clamped parallel axis, ragged tail + ragged quant block)
    x_large = jax.random.normal(k2, (16, 16, 64, 100), dtype=jnp.float32)   # 6.25 MiB
    y_large = jax.block_until_ready(quant(x_large))
    ref_large, s_large = _ref_quint8_reduce_range(x_large)
    _check(y_large, ref_large, s_large, "tiled/quint8")

    # 3) qint8 (symmetric observer) on the fused path
    x_q = jax.random.normal(k3, (4, 32, 32), dtype=jnp.float32)
    quant_s = FakeDynamicQuant(dtype="qint8")
    y_q = jax.block_until_ready(quant_s(x_q))
    ref_q, s_q = _ref_qint8_reduce_range(x_q)
    _check(y_q, ref_q, s_q, "fused/qint8")

    # 4) ragged size (not a multiple of 1024) -> exercises the edge-pad path
    x_rag = jax.random.normal(k4, (3, 5, 7, 11), dtype=jnp.float32)
    y_rag = jax.block_until_ready(quant(x_rag))
    ref_rag, s_rag = _ref_quint8_reduce_range(x_rag)
    _check(y_rag, ref_rag, s_rag, "fused/ragged")

    print("KERNEL_OK")
</pallas_src>

<mosaic_0001>
module attributes {stable_mosaic.version = 11 : i64} {
  func.func @_fused_kernel(%arg0: i32, %arg1: memref<16x128xf32, #tpu.memory_space<vmem>>, %arg2: memref<16x128xf32, #tpu.memory_space<vmem>>, %arg3: memref<1x1xf32, #tpu.memory_space<vmem>>, %arg4: memref<1x1xf32, #tpu.memory_space<vmem>>) attributes {dimension_semantics = [#tpu.dimension_semantics<arbitrary>], iteration_bounds = array<i64: 1>, scalar_prefetch = 0 : i64, scratch_operands = 0 : i64, tpu.core_type = #tpu.core_type<tc>, window_params = [{pipeline_mode = #tpu.pipeline_mode<synchronous>, transform_indices = @transform_0, window_bounds = array<i64: 16, 128>}, {pipeline_mode = #tpu.pipeline_mode<synchronous>, transform_indices = @transform_1, window_bounds = array<i64: 16, 128>}, {pipeline_mode = #tpu.pipeline_mode<synchronous>, transform_indices = @transform_2, window_bounds = array<i64: 1, 1>}, {pipeline_mode = #tpu.pipeline_mode<synchronous>, transform_indices = @transform_3, window_bounds = array<i64: 1, 1>}]} {
    %c0 = arith.constant 0 : index
    %c0_0 = arith.constant 0 : index
    %0 = vector.load %arg1[%c0, %c0_0] : memref<16x128xf32, #tpu.memory_space<vmem>>, vector<16x128xf32>
    %1 = vector.shape_cast %0 : vector<16x128xf32> to vector<1x16x128xf32>
    %cst = arith.constant dense<0x7F800000> : vector<1xf32>
    %2 = vector.multi_reduction <minimumf>, %1, %cst [1, 2] : vector<1x16x128xf32> to vector<1xf32>
    %3 = vector.shape_cast %2 : vector<1xf32> to vector<1x1x1xf32>
    %4 = vector.extract %3[0, 0, 0] : f32 from vector<1x1x1xf32>
    %5 = vector.broadcast %4 : f32 to vector<1x1xf32>
    %6 = vector.shape_cast %0 : vector<16x128xf32> to vector<1x16x128xf32>
    %cst_1 = arith.constant dense<0xFF800000> : vector<1xf32>
    %7 = vector.multi_reduction <maximumf>, %6, %cst_1 [1, 2] : vector<1x16x128xf32> to vector<1xf32>
    %8 = vector.shape_cast %7 : vector<1xf32> to vector<1x1x1xf32>
    %9 = vector.extract %8[0, 0, 0] : f32 from vector<1x1x1xf32>
    %10 = vector.broadcast %9 : f32 to vector<1x1xf32>
    %cst_2 = arith.constant 0.000000e+00 : f32
    %11 = vector.broadcast %cst_2 : f32 to vector<1x1xf32>
    %12 = arith.minimumf %5, %11 : vector<1x1xf32>
    %cst_3 = arith.constant 0.000000e+00 : f32
    %13 = vector.broadcast %cst_3 : f32 to vector<1x1xf32>
    %14 = arith.maximumf %10, %13 : vector<1x1xf32>
    %15 = arith.subf %14, %12 : vector<1x1xf32>
    %cst_4 = arith.constant 1.270000e+02 : f32
    %16 = vector.broadcast %cst_4 : f32 to vector<1x1xf32>
    %17 = arith.divf %15, %16 : vector<1x1xf32>
    %cst_5 = arith.constant 1.1920929E-7 : f32
    %18 = vector.broadcast %cst_5 : f32 to vector<1x1xf32>
    %19 = arith.maximumf %17, %18 : vector<1x1xf32>
    %20 = arith.divf %12, %19 : vector<1x1xf32>
    %21 = math.roundeven %20 : vector<1x1xf32>
    %cst_6 = arith.constant 0.000000e+00 : f32
    %22 = vector.broadcast %cst_6 : f32 to vector<1x1xf32>
    %23 = arith.subf %22, %21 : vector<1x1xf32>
    %cst_7 = arith.constant 0.000000e+00 : f32
    %cst_8 = arith.constant 1.270000e+02 : f32
    %24 = vector.broadcast %cst_7 : f32 to vector<1x1xf32>
    %25 = arith.maximumf %24, %23 : vector<1x1xf32>
    %26 = vector.broadcast %cst_8 : f32 to vector<1x1xf32>
    %27 = arith.minimumf %26, %25 : vector<1x1xf32>
    %cst_9 = arith.constant 0.000000e+00 : f32
    %cst_10 = arith.constant 1.280000e+02 : f32
    %28 = vector.broadcast %cst_9 : f32 to vector<1x1xf32>
    %29 = arith.maximumf %28, %27 : vector<1x1xf32>
    %30 = vector.broadcast %cst_10 : f32 to vector<1x1xf32>
    %31 = arith.minimumf %30, %29 : vector<1x1xf32>
    %cst_11 = arith.constant 1.000000e+00 : f32
    %32 = vector.broadcast %cst_11 : f32 to vector<1x1xf32>
    %33 = arith.divf %32, %19 : vector<1x1xf32>
    %34 = vector.broadcast %33 : vector<1x1xf32> to vector<16x128xf32>
    %35 = arith.mulf %0, %34 : vector<16x128xf32>
    %36 = vector.broadcast %31 : vector<1x1xf32> to vector<16x128xf32>
    %37 = arith.addf %35, %36 : vector<16x128xf32>
    %38 = math.roundeven %37 : vector<16x128xf32>
    %cst_12 = arith.constant 0.000000e+00 : f32
    %cst_13 = arith.constant 1.280000e+02 : f32
    %39 = vector.broadcast %cst_12 : f32 to vector<16x128xf32>
    %40 = arith.maximumf %39, %38 : vector<16x128xf32>
    %41 = vector.broadcast %cst_13 : f32 to vector<16x128xf32>
    %42 = arith.minimumf %41, %40 : vector<16x128xf32>
    %43 = vector.broadcast %31 : vector<1x1xf32> to vector<16x128xf32>
    %44 = arith.subf %42, %43 : vector<16x128xf32>
    %45 = vector.broadcast %19 : vector<1x1xf32> to vector<16x128xf32>
    %46 = arith.mulf %44, %45 : vector<16x128xf32>
    %c0_14 = arith.constant 0 : index
    %c0_15 = arith.constant 0 : index
    %47 = vector.load %arg2[%c0_14, %c0_15] : memref<16x128xf32, #tpu.memory_space<vmem>>, vector<16x128xf32>
    tpu.vector_store %arg2[%c0_14, %c0_15], %46 {strides = array<i32>} : memref<16x128xf32, #tpu.memory_space<vmem>>, vector<16x128xf32>,
    %c0_16 = arith.constant 0 : index
    %c0_17 = arith.constant 0 : index
    %48 = vector.load %arg3[%c0_16, %c0_17] : memref<1x1xf32, #tpu.memory_space<vmem>>, vector<1x1xf32>
    tpu.vector_store %arg3[%c0_16, %c0_17], %19 {strides = array<i32>} : memref<1x1xf32, #tpu.memory_space<vmem>>, vector<1x1xf32>,
    %c0_18 = arith.constant 0 : index
    %c0_19 = arith.constant 0 : index
    %49 = vector.load %arg4[%c0_18, %c0_19] : memref<1x1xf32, #tpu.memory_space<vmem>>, vector<1x1xf32>
    tpu.vector_store %arg4[%c0_18, %c0_19], %31 {strides = array<i32>} : memref<1x1xf32, #tpu.memory_space<vmem>>, vector<1x1xf32>,
    return
  }
  func.func @transform_0(%arg0: i32) -> (i32, i32) {
    %c0_i32 = arith.constant 0 : i32
    %c0_i32_0 = arith.constant 0 : i32
    %c0_i32_1 = arith.constant 0 : i32
    return %c0_i32, %c0_i32_0 : i32, i32
  }
  func.func @transform_1(%arg0: i32) -> (i32, i32) {
    %c0_i32 = arith.constant 0 : i32
    %c0_i32_0 = arith.constant 0 : i32
    %c0_i32_1 = arith.constant 0 : i32
    return %c0_i32, %c0_i32_0 : i32, i32
  }
  func.func @transform_2(%arg0: i32) -> (i32, i32) {
    %c0_i32 = arith.constant 0 : i32
    %c0_i32_0 = arith.constant 0 : i32
    %c0_i32_1 = arith.constant 0 : i32
    return %c0_i32, %c0_i32_0 : i32, i32
  }
  func.func @transform_3(%arg0: i32) -> (i32, i32) {
    %c0_i32 = arith.constant 0 : i32
    %c0_i32_0 = arith.constant 0 : i32
    %c0_i32_1 = arith.constant 0 : i32
    return %c0_i32, %c0_i32_0 : i32, i32
  }
}

</mosaic_0001>

<bundles_post_ra>
// kernel: tpu_custom_call.1
= control target key start
LH: loop header
LB: loop body
LE: loop exit
PB: predicated region body
PF: predicated region fallthrough
CT: control target
= control target key end

     0   :  { %9 = vsyncpa [#allocation3], 0  ;;  %s320_s0 = inlined_call_operand.hbm [shape: f32[16,128], index: 0, kind: input, shape index: {}]   ;;  %s321_s1 = inlined_call_operand.hbm [shape: f32[16,128], index: 1, kind: output, shape index: {0}]   ;;  %s322_s2 = inlined_call_operand.hbm [shape: f32[1,1], index: 2, kind: output, shape index: {1}]   ;;  %s323_s3 = inlined_call_operand.hbm [shape: f32[1,1], index: 3, kind: output, shape index: {2}]  }
   0x1   :  { %10 = vsyncpa [#allocation4], 0 }
   0x2   :  { %11 = vsyncpa [#allocation7], 0  ;;  %s238_s12 = smov [#allocation2]   ;;  %s144_s16 = scalar_lea.hbm %s320_s0, 256 }
   0x3   :  { %s17_s13 = sshll.u32 %s238_s12, 4  ;;  %p145_p0 = scmp.ne.s32.totalorder %s320_s0, %s144_s16  ;;  %s18_s13 = int_to_ptr.vmem [resolvable:$true] %s17_s13 }
   0x4   :  { %p148_p1 = scmp.lt.u32.totalorder %s144_s16, %s320_s0 }
   0x6   :  { %p150_p2 = pnand %p148_p1, %p145_p0 }
   0x8   :  { %153 = shalt.err (!%p150_p2)
}
   0x9   :  { %s154_s21 = scalar_lea.vmem %s18_s13, 256  ;;  %p159_p4 = scmp.lt.s32.totalorder %s18_s13, %s18_s13 }
   0xa   :  { %p155_p3 = scmp.ne.s32.totalorder %s18_s13, %s154_s21  ;;  %p160_p5 = scmp.lt.s32.totalorder %s154_s21, %s154_s21 }
   0xc   :  { %p161_p6 = por %p160_p5, %p159_p4 }
   0xe   :  { %p162_p7 = pnand %p161_p6, %p155_p3 }
  0x10   :  { %165 = shalt.err (!%p162_p7)
}
  0x11   :  { %s239_s22 = smov 128   ;;  %s240_s23 = smov 8  }
  0x12   :  { %23 = dma.hbm_to_vmem [thread:$0]  %s320_s0, 256, %s18_s13, [#allocation3], %s239_s22, %s239_s22, %s240_s23  }
  0x13   :  { %232 = dma.done.wait [#allocation3], 256  }
  0x14   :  { %233 = vsyncadd [#allocation3], 4294967040  ;;  %v27_v0 = vld [vmem:[#allocation2] sm:$0xff]  ;;  %v28_v1 = vld [vmem:[#allocation2 + $0x8] sm:$0xff]  ;;  %s241_s27 = smov [#allocation6]   ;;  %vm82_vm0 = vcmask 0  }
  0x15   :  { %v29_v2 = vmin.f32 %v27_v0, %v28_v1  ;;  %v40_v3 = vmax.f32 %v27_v0, %v28_v1  ;;  %s103_s28 = sshll.u32 %s241_s27, 4  ;;  %s104_s28 = int_to_ptr.vmem [resolvable:$true] %s103_s28 }
  0x16   :  { %s166_s29 = scalar_lea.vmem %s104_s28, 16  ;;  %s170_s30 = scalar_lea.vmem %s104_s28, 32 }
  0x17   :  { %30 = vmin.xlane.f32.xlu0 %v29_v2  ;;  %p167_p8 = scmp.ne.s32.totalorder %s104_s28, %s166_s29  ;;  %p171_p9 = scmp.lt.s32.totalorder %s104_s28, %s104_s28 }
  0x18   :  { %p172_p10 = scmp.lt.s32.totalorder %s170_s30, %s166_s29 }
  0x1a   :  { %p173_p11 = por %p172_p10, %p171_p9 }
  0x1b   :  { %41 = vmax.xlane.f32.xlu0 %v40_v3 }
  0x1c   :  { %p174_p12 = pnand %p173_p11, %p167_p8 }
  0xa4   :  { %v31_v4 = vpop.xlane.xlu0 %30 }
  0xa5   :  { %v32_v5 = vrot.slane %v31_v4, 4 }
  0xa7   :  { %v33_v6 = vmin.f32 %v31_v4, %v32_v5 }
  0xa8   :  { %v42_v7 = vpop.xlane.xlu0 %41 }
  0xa9   :  { %v34_v8 = vrot.slane %v33_v6, 2  ;;  %v43_v9 = vrot.slane %v42_v7, 4 }
  0xab   :  { %v44_v10 = vmax.f32 %v42_v7, %v43_v9  ;;  %v35_v11 = vmin.f32 %v33_v6, %v34_v8 }
  0xad   :  { %v45_v12 = vrot.slane %v44_v10, 2  ;;  %v36_v13 = vrot.slane %v35_v11, 1 }
  0xaf   :  { %v46_v14 = vmax.f32 %v44_v10, %v45_v12  ;;  %v37_v15 = vmin.f32 %v35_v11, %v36_v13 }
  0xb1   :  { %129 = vpush %v37_v15  ;;  %v47_v16 = vrot.slane %v46_v14, 1 }
  0xb3   :  { %v48_v17 = vmax.f32 %v46_v14, %v47_v16 }
  0xb5   :  { %131 = vpush %v48_v17 }
  0xe2   :  { %s130_s0 = spop %129 }
  0xe3   :  { %v39_v18 = vstv %s130_s0 }
  0xe4   :  { %v51_v20 = vmin.f32 %v39_v18, 0.0 }
  0xe6   :  { %s132_s26 = spop %131 }
  0xe7   :  { %v50_v19 = vstv %s132_s26 }
  0xe8   :  { %v52_v21 = vmax.f32 %v50_v19, 0.0 }
  0xea   :  { %v53_v22 = vsub.f32 %v52_v21, %v51_v20 }
  0xec   :  { %v55_v23 = vmul.f32 0.007874016, %v53_v22 }
  0xee   :  { %v56_v24 = vmax.f32 %v55_v23, 1.1920929e-07 }
  0xf0   :  { %142 = vrcp.f32 %v56_v24  ;;  %83 = vst.msk [vmem:[#allocation6] sm:$0x1] %vm82_vm0, %v56_v24 }
  0xf1   :  { %177 = shalt.err (!%p174_p12)
}
  0xf2   :  { %s178_s6 = scalar_lea.hbm %s322_s2, 16 }
  0xf3   :  { %p179_p13 = scmp.ne.s32.totalorder %s322_s2, %s178_s6  ;;  %p182_p0 = scmp.lt.u32.totalorder %s178_s6, %s322_s2 }
  0xf5   :  { %p184_p1 = pnand %p182_p0, %p179_p13 }
  0xf7   :  { %187 = shalt.err (!%p184_p1)
}
  0xf8   :  { %106 = dma.vmem_to_hbm [thread:$0]  %s104_s28, 16, %s322_s2, [#allocation7]  }
  0xf9   :  { %s242_s13 = smov [#allocation8]  }
  0xfa   :  { %v143_v25 = vpop.eup %142  ;;  %s113_s14 = sshll.u32 %s242_s13, 4  ;;  %s114_s14 = int_to_ptr.vmem [resolvable:$true] %s113_s14 }
  0xfb   :  { %v58_v26 = vmul.f32 %v143_v25, %v51_v20  ;;  %v66_v33 = vmul.f32 %v143_v25, %v27_v0  ;;  %v67_v34 = vmul.f32 %v143_v25, %v28_v1  ;;  %s188_s15 = scalar_lea.vmem %s114_s14, 16  ;;  %s192_s2 = scalar_lea.vmem %s114_s14, 32 }
  0xfc   :  { %p189_p2 = scmp.ne.s32.totalorder %s114_s14, %s188_s15  ;;  %p193_p3 = scmp.lt.s32.totalorder %s114_s14, %s114_s14 }
  0xfd   :  { %v133_v27 = vround.rtne.f32 %v58_v26  ;;  %p194_p4 = scmp.lt.s32.totalorder %s192_s2, %s188_s15 }
  0xff   :  { %v60_v28 = vsub.f32 0.0, %v133_v27  ;;  %p195_p5 = por %p194_p4, %p193_p3 }
 0x101   :  { %v61_v29 = vmax.f32 %v60_v28, 0.0  ;;  %p196_p6 = pnand %p195_p5, %p189_p2 }
 0x103   :  { %v62_v30 = vmin.f32 %v61_v29, 127.0 }
 0x105   :  { %v63_v31 = vmax.f32 %v62_v30, 0.0 }
 0x107   :  { %v64_v32 = vmin.f32 %v63_v31, 128.0 }
 0x109   :  { %v68_v35 = vadd.f32 %v66_v33, %v64_v32  ;;  %v69_v36 = vadd.f32 %v67_v34, %v64_v32  ;;  %84 = vst.msk [vmem:[#allocation8] sm:$0x1] %vm82_vm0, %v64_v32 }
 0x10a   :  { %199 = shalt.err (!%p196_p6)
}
 0x10b   :  { %s200_s18 = scalar_lea.hbm %s323_s3, 16 }
 0x10c   :  { %p201_p7 = scmp.ne.s32.totalorder %s323_s3, %s200_s18  ;;  %p204_p8 = scmp.lt.u32.totalorder %s200_s18, %s323_s3 }
 0x10e   :  { %p206_p9 = pnand %p204_p8, %p201_p7 }
 0x110   :  { %209 = shalt.err (!%p206_p9)
}
 0x111   :  { %116 = dma.vmem_to_hbm [thread:$0]  %s114_s14, 16, %s323_s3, [#allocation7]   ;;  %v134_v37 = vround.rtne.f32 %v68_v35  ;;  %v135_v38 = vround.rtne.f32 %v69_v36 }
 0x112   :  { %s243_s26 = smov [#allocation5]  }
 0x113   :  { %v72_v39 = vmax.f32 %v134_v37, 0.0  ;;  %v73_v40 = vmax.f32 %v135_v38, 0.0  ;;  %s90_s27 = sshll.u32 %s243_s26, 4  ;;  %s91_s27 = int_to_ptr.vmem [resolvable:$true] %s90_s27 }
 0x114   :  { %s210_s28 = scalar_lea.vmem %s91_s27, 256  ;;  %p215_p11 = scmp.lt.s32.totalorder %s91_s27, %s91_s27 }
 0x115   :  { %v74_v41 = vmin.f32 %v72_v39, 128.0  ;;  %v75_v42 = vmin.f32 %v73_v40, 128.0  ;;  %p211_p10 = scmp.ne.s32.totalorder %s91_s27, %s210_s28  ;;  %p216_p12 = scmp.lt.s32.totalorder %s210_s28, %s210_s28 }
 0x117   :  { %v76_v43 = vsub.f32 %v74_v41, %v64_v32  ;;  %v77_v44 = vsub.f32 %v75_v42, %v64_v32  ;;  %p217_p13 = por %p216_p12, %p215_p11 }
 0x119   :  { %v78_v45 = vmul.f32 %v76_v43, %v56_v24  ;;  %v79_v46 = vmul.f32 %v77_v44, %v56_v24  ;;  %p218_p0 = pnand %p217_p13, %p211_p10 }
 0x11b   :  { %80 = vst [vmem:[#allocation5] sm:$0xff] %v78_v45  ;;  %81 = vst [vmem:[#allocation5 + $0x8] sm:$0xff] %v79_v46 }
 0x11c   :  { %221 = shalt.err (!%p218_p0)
}
 0x11d   :  { %s222_s30 = scalar_lea.hbm %s321_s1, 256 }
 0x11e   :  { %p223_p1 = scmp.ne.s32.totalorder %s321_s1, %s222_s30  ;;  %p226_p2 = scmp.lt.u32.totalorder %s222_s30, %s321_s1 }
 0x120   :  { %p228_p3 = pnand %p226_p2, %p223_p1 }
 0x122   :  { %231 = shalt.err (!%p228_p3)
}
 0x123   :  { %96 = dma.vmem_to_hbm [thread:$0]  %s91_s27, 256, %s321_s1, [#allocation4], %s239_s22, %s239_s22, %s240_s23  }
 0x124   :  { %234 = dma.done.wait [#allocation4], 256  }
 0x125   :  { %235 = vsyncadd [#allocation4], 4294967040 }
 0x126   :  { %236 = dma.done.wait [#allocation7], 32  }
 0x127   :  { %237 = vsyncadd [#allocation7], 4294967264 }
 0x128   :  { %126 = vsyncpa [#allocation3], 1 }
 0x129   :  { %127 = vsyncpa [#allocation4], 1 }
 0x12a   :  { %128 = vsyncpa [#allocation7], 1 }

</bundles_post_ra>
